<compile_context>
chip_gen: v7x
topology: tpu7x:2x2x1
jax: 0.10.0
libtpu: 0.0.40
codegen_flags: <defaults>
</compile_context>

<pallas_src>
import functools
import math

import jax
import jax.numpy as jnp
from jax.experimental import pallas as pl
from jax.experimental.pallas import tpu as pltpu


def _merge_kernel(ne_ref, s1_ref, s2_ref, w_ref, b_ref, o_ref, x_scratch, *, E, H):
    # In-VMEM concat: [TB, E] | [TB, H] | [TB, H] -> x_scratch [TB, D].
    x_scratch[:, 0:E] = ne_ref[...]
    x_scratch[:, E:E + H] = s1_ref[...]
    x_scratch[:, E + H:E + 2 * H] = s2_ref[...]

    # Single fused matmul on the MXU: [TB, D] @ [D, 2H] -> f32 accumulate.
    h2 = jnp.dot(x_scratch[...], w_ref[...], preferred_element_type=jnp.float32)
    h2 = h2 + b_ref[...]  # bias broadcast (1, 2H) -> (TB, 2H), f32

    # Gating stays in f32 (v5e has no bf16 VPU/EUP).
    sub_tree = jnp.tanh(h2[:, :H])
    gate = jax.nn.sigmoid(h2[:, H:])
    o_ref[...] = (sub_tree * gate).astype(o_ref.dtype)


def merge_forward(node_embedding, sub_tree_1, sub_tree_2, fused_params,
                  *, compute_dtype=jnp.float32, block_b=128):
    """Pallas forward for Merge (dropout = identity at inference).

    fused_params: {"w2": [D, 2H], "b2": [1, 2H]} with D = E + 2H.
    compute_dtype: matmul input dtype (bf16 recommended on v6e/v7x);
                   accumulation + gating are always f32.
    """
    w2, b2 = fused_params["w2"], fused_params["b2"]
    B, E = node_embedding.shape
    H = sub_tree_1.shape[1]
    D = E + 2 * H
    assert w2.shape == (D, 2 * H) and b2.shape == (1, 2 * H)
    out_dtype = node_embedding.dtype

    # Cast matmul operands once in the wrapper (halves activation/weight DMA
    # when compute_dtype is bf16); bias stays f32 (added after accumulation).
    ne = node_embedding.astype(compute_dtype)
    s1 = sub_tree_1.astype(compute_dtype)
    s2 = sub_tree_2.astype(compute_dtype)
    wc = w2.astype(compute_dtype)
    bf = b2.astype(jnp.float32)

    # Batch tile: big enough to amortize per-step overhead, multiple of 8
    # (sublane) unless the whole batch is smaller than that.
    tb = min(B, block_b)
    if B >= 8:
        tb = max(8, (tb // 8) * 8)
    grid = (pl.cdiv(B, tb),)

    item_in = jnp.dtype(compute_dtype).itemsize
    cost = pl.CostEstimate(
        flops=2 * B * D * (2 * H),
        transcendentals=2 * B * H,
        bytes_accessed=(B * D * item_in                     # activations
                        + D * 2 * H * item_in               # fused weight
                        + 2 * H * 4                         # fused bias
                        + B * H * jnp.dtype(out_dtype).itemsize),
    )

    kernel = functools.partial(_merge_kernel, E=E, H=H)

    out = pl.pallas_call(
        kernel,
        out_shape=jax.ShapeDtypeStruct((B, H), out_dtype),
        grid_spec=pltpu.PrefetchScalarGridSpec(
            num_scalar_prefetch=0,
            grid=grid,
            in_specs=[
                pl.BlockSpec((tb, E), lambda i: (i, 0)),        # node_embedding tile
                pl.BlockSpec((tb, H), lambda i: (i, 0)),        # sub_tree_1 tile
                pl.BlockSpec((tb, H), lambda i: (i, 0)),        # sub_tree_2 tile
                pl.BlockSpec((D, 2 * H), lambda i: (0, 0)),     # fused weight, VMEM-resident
                pl.BlockSpec((1, 2 * H), lambda i: (0, 0)),     # fused bias, VMEM-resident
            ],
            out_specs=pl.BlockSpec((tb, H), lambda i: (i, 0)),
            scratch_shapes=[pltpu.VMEM((tb, D), compute_dtype)],  # in-kernel concat buffer
        ),
        compiler_params=pltpu.CompilerParams(
            dimension_semantics=("parallel",),  # batch axis shards across TCs on v7x
        ),
        cost_estimate=cost,
    )(ne, s1, s2, wc, bf)
    return out


def init_merge_params(key, hidden_size, embedding_size, dtype=jnp.float32):
    """Init matching nn.Linear default (uniform +/- 1/sqrt(fan_in)); weights
    stored as [in_features, out_features] (transposed vs. PyTorch)."""
    in_features = hidden_size * 2 + embedding_size
    bound = 1.0 / math.sqrt(in_features)
    k1, k2, k3, k4 = jax.random.split(key, 4)
    w = jax.random.uniform(k1, (in_features, hidden_size), dtype, -bound, bound)
    b = jax.random.uniform(k2, (1, hidden_size), dtype, -bound, bound)
    wg = jax.random.uniform(k3, (in_features, hidden_size), dtype, -bound, bound)
    bg = jax.random.uniform(k4, (1, hidden_size), dtype, -bound, bound)
    return {"w": w, "b": b, "wg": wg, "bg": bg}


def fuse_merge_params(params):
    """One-time fusion of merge / merge_g into a single [D, 2H] linear."""
    return {
        "w2": jnp.concatenate([params["w"], params["wg"]], axis=1),
        "b2": jnp.concatenate([params["b"], params["bg"]], axis=1),
    }


def _reference(ne, s1, s2, params):
    x = jnp.concatenate([ne, s1, s2], axis=1)
    return jnp.tanh(x @ params["w"] + params["b"]) * jax.nn.sigmoid(
        x @ params["wg"] + params["bg"]
    )


if __name__ == "__main__":
    hidden_size = 32
    embedding_size = 32
    batch = 8

    key = jax.random.PRNGKey(0)
    k_params, k_ne, k_s1, k_s2 = jax.random.split(key, 4)

    params = init_merge_params(k_params, hidden_size, embedding_size)
    fused = fuse_merge_params(params)

    node_embedding = jax.random.normal(k_ne, (batch, embedding_size), jnp.float32)
    sub_tree_1 = jax.random.normal(k_s1, (batch, hidden_size), jnp.float32)
    sub_tree_2 = jax.random.normal(k_s2, (batch, hidden_size), jnp.float32)

    # --- f32 path, small batch (tight tolerance) ---
    out = merge_forward(node_embedding, sub_tree_1, sub_tree_2, fused,
                        compute_dtype=jnp.float32)
    out = jax.block_until_ready(out)
    ref = _reference(node_embedding, sub_tree_1, sub_tree_2, params)
    assert out.shape == (batch, hidden_size)
    assert jnp.allclose(out, ref, atol=1e-5, rtol=1e-5)

    # --- bf16-matmul path, larger batch exercising a multi-block parallel grid ---
    big = 256
    kb = jax.random.split(jax.random.PRNGKey(1), 3)
    ne_b = jax.random.normal(kb[0], (big, embedding_size), jnp.float32)
    s1_b = jax.random.normal(kb[1], (big, hidden_size), jnp.float32)
    s2_b = jax.random.normal(kb[2], (big, hidden_size), jnp.float32)
    out_b = merge_forward(ne_b, s1_b, s2_b, fused,
                          compute_dtype=jnp.bfloat16, block_b=128)
    out_b = jax.block_until_ready(out_b)
    ref_b = _reference(ne_b, s1_b, s2_b, params)
    assert out_b.shape == (big, hidden_size)
    assert jnp.allclose(out_b, ref_b, atol=3e-2, rtol=3e-2)

    print("KERNEL_OK")
</pallas_src>

<mosaic_0001>
module attributes {stable_mosaic.version = 11 : i64} {
  func.func @_merge_kernel(%arg0: i32, %arg1: memref<8x32xf32, #tpu.memory_space<vmem>>, %arg2: memref<8x32xf32, #tpu.memory_space<vmem>>, %arg3: memref<8x32xf32, #tpu.memory_space<vmem>>, %arg4: memref<96x64xf32, #tpu.memory_space<vmem>>, %arg5: memref<1x64xf32, #tpu.memory_space<vmem>>, %arg6: memref<8x32xf32, #tpu.memory_space<vmem>>, %arg7: memref<8x96xf32, #tpu.memory_space<vmem>>) attributes {dimension_semantics = [#tpu.dimension_semantics<parallel>], iteration_bounds = array<i64: 1>, scalar_prefetch = 0 : i64, scratch_operands = 1 : i64, tpu.core_type = #tpu.core_type<tc>, window_params = [{transform_indices = @transform_0, window_bounds = array<i64: 8, 32>}, {transform_indices = @transform_1, window_bounds = array<i64: 8, 32>}, {transform_indices = @transform_2, window_bounds = array<i64: 8, 32>}, {pipeline_mode = #tpu.pipeline_mode<synchronous>, transform_indices = @transform_3, window_bounds = array<i64: 96, 64>}, {pipeline_mode = #tpu.pipeline_mode<synchronous>, transform_indices = @transform_4, window_bounds = array<i64: 1, 64>}, {transform_indices = @transform_5, window_bounds = array<i64: 8, 32>}]} {
    %c0 = arith.constant 0 : index
    %c0_0 = arith.constant 0 : index
    %0 = vector.load %arg1[%c0, %c0_0] : memref<8x32xf32, #tpu.memory_space<vmem>>, vector<8x32xf32>
    %c0_1 = arith.constant 0 : index
    %c0_2 = arith.constant 0 : index
    %1 = vector.load %arg7[%c0_1, %c0_2] : memref<8x96xf32, #tpu.memory_space<vmem>>, vector<8x32xf32>
    tpu.vector_store %arg7[%c0_1, %c0_2], %0 {strides = array<i32>} : memref<8x96xf32, #tpu.memory_space<vmem>>, vector<8x32xf32>,
    %c0_3 = arith.constant 0 : index
    %c0_4 = arith.constant 0 : index
    %2 = vector.load %arg2[%c0_3, %c0_4] : memref<8x32xf32, #tpu.memory_space<vmem>>, vector<8x32xf32>
    %c0_5 = arith.constant 0 : index
    %c32 = arith.constant 32 : index
    %3 = vector.load %arg7[%c0_5, %c32] : memref<8x96xf32, #tpu.memory_space<vmem>>, vector<8x32xf32>
    tpu.vector_store %arg7[%c0_5, %c32], %2 {strides = array<i32>} : memref<8x96xf32, #tpu.memory_space<vmem>>, vector<8x32xf32>,
    %c0_6 = arith.constant 0 : index
    %c0_7 = arith.constant 0 : index
    %4 = vector.load %arg3[%c0_6, %c0_7] : memref<8x32xf32, #tpu.memory_space<vmem>>, vector<8x32xf32>
    %c0_8 = arith.constant 0 : index
    %c64 = arith.constant 64 : index
    %5 = vector.load %arg7[%c0_8, %c64] : memref<8x96xf32, #tpu.memory_space<vmem>>, vector<8x32xf32>
    tpu.vector_store %arg7[%c0_8, %c64], %4 {strides = array<i32>} : memref<8x96xf32, #tpu.memory_space<vmem>>, vector<8x32xf32>,
    %c0_9 = arith.constant 0 : index
    %c0_10 = arith.constant 0 : index
    %6 = vector.load %arg7[%c0_9, %c0_10] : memref<8x96xf32, #tpu.memory_space<vmem>>, vector<8x96xf32>
    %c0_11 = arith.constant 0 : index
    %c0_12 = arith.constant 0 : index
    %7 = vector.load %arg4[%c0_11, %c0_12] : memref<96x64xf32, #tpu.memory_space<vmem>>, vector<96x64xf32>
    %cst = arith.constant dense<0.000000e+00> : vector<8x64xf32>
    %8 = tpu.matmul %6, %7, %cst {dimension_numbers = #tpu.dot_dimension_numbers<[1], [0], [0], [1], [0, 0, 1, 1], [], []>} : vector<8x96xf32>, vector<96x64xf32>, vector<8x64xf32> -> vector<8x64xf32>
    %c0_13 = arith.constant 0 : index
    %c0_14 = arith.constant 0 : index
    %9 = vector.load %arg5[%c0_13, %c0_14] : memref<1x64xf32, #tpu.memory_space<vmem>>, vector<1x64xf32>
    %10 = vector.broadcast %9 : vector<1x64xf32> to vector<8x64xf32>
    %11 = arith.addf %8, %10 : vector<8x64xf32>
    %12 = vector.extract_strided_slice %11 {offsets = [0, 0], sizes = [8, 32], strides = [1, 1]} : vector<8x64xf32> to vector<8x32xf32>
    %13 = math.tanh %12 : vector<8x32xf32>
    %14 = vector.extract_strided_slice %11 {offsets = [0, 32], sizes = [8, 32], strides = [1, 1]} : vector<8x64xf32> to vector<8x32xf32>
    %15 = arith.negf %14 : vector<8x32xf32>
    %16 = math.exp %15 : vector<8x32xf32>
    %cst_15 = arith.constant 1.000000e+00 : f32
    %17 = vector.broadcast %cst_15 : f32 to vector<8x32xf32>
    %18 = arith.addf %17, %16 : vector<8x32xf32>
    %19 = arith.divf %17, %18 : vector<8x32xf32>
    %20 = arith.mulf %13, %19 : vector<8x32xf32>
    %c0_16 = arith.constant 0 : index
    %c0_17 = arith.constant 0 : index
    %21 = vector.load %arg6[%c0_16, %c0_17] : memref<8x32xf32, #tpu.memory_space<vmem>>, vector<8x32xf32>
    tpu.vector_store %arg6[%c0_16, %c0_17], %20 {strides = array<i32>} : memref<8x32xf32, #tpu.memory_space<vmem>>, vector<8x32xf32>,
    return
  }
  func.func @transform_0(%arg0: i32) -> (i32, i32) {
    %c0_i32 = arith.constant 0 : i32
    %c0_i32_0 = arith.constant 0 : i32
    return %arg0, %c0_i32 : i32, i32
  }
  func.func @transform_1(%arg0: i32) -> (i32, i32) {
    %c0_i32 = arith.constant 0 : i32
    %c0_i32_0 = arith.constant 0 : i32
    return %arg0, %c0_i32 : i32, i32
  }
  func.func @transform_2(%arg0: i32) -> (i32, i32) {
    %c0_i32 = arith.constant 0 : i32
    %c0_i32_0 = arith.constant 0 : i32
    return %arg0, %c0_i32 : i32, i32
  }
  func.func @transform_3(%arg0: i32) -> (i32, i32) {
    %c0_i32 = arith.constant 0 : i32
    %c0_i32_0 = arith.constant 0 : i32
    %c0_i32_1 = arith.constant 0 : i32
    return %c0_i32, %c0_i32_0 : i32, i32
  }
  func.func @transform_4(%arg0: i32) -> (i32, i32) {
    %c0_i32 = arith.constant 0 : i32
    %c0_i32_0 = arith.constant 0 : i32
    %c0_i32_1 = arith.constant 0 : i32
    return %c0_i32, %c0_i32_0 : i32, i32
  }
  func.func @transform_5(%arg0: i32) -> (i32, i32) {
    %c0_i32 = arith.constant 0 : i32
    %c0_i32_0 = arith.constant 0 : i32
    return %arg0, %c0_i32 : i32, i32
  }
}

</mosaic_0001>

<bundles_post_ra>
// kernel: tpu_custom_call.1
= control target key start
LH: loop header
LB: loop body
LE: loop exit
PB: predicated region body
PF: predicated region fallthrough
CT: control target
= control target key end

     0   :  { %s257_s22 = smov 32   ;;  %v258_v2 = vmov 0.0|0.0   ;;  %vm22_vm0 = vcmask 261120   ;;  %vm259_vm1 = vmmov 0   ;;  %v260_v9 = vmov 0.0   ;;  %s261_s7 = smov 64   ;;  %s356_s0 = inlined_call_operand.vmem [shape: f32[8,32], index: 0, kind: input, shape index: {}]   ;;  %s357_s1 = inlined_call_operand.vmem [shape: f32[8,32], index: 1, kind: input, shape index: {}]   ;;  %s358_s2 = inlined_call_operand.vmem [shape: f32[8,32], index: 2, kind: input, shape index: {}]   ;;  %s359_s3 = inlined_call_operand.vmem [shape: f32[96,64], index: 3, kind: input, shape index: {}]   ;;  %s360_s4 = inlined_call_operand.vmem [shape: f32[1,64], index: 4, kind: input, shape index: {}]   ;;  %s361_s5 = inlined_call_operand.hbm [shape: f32[8,32], index: 5, kind: output, shape index: {}]  }
   0x1   :  { %v24_v0 = vld [vmem:[%s357_s1] sm:$0xff]  ;;  %202 = vmatprep.subr.bf16.mxu0 %v258_v2  ;;  %v40_v3 = vld [vmem:[%s359_s3 + $0x8] sm:$0xff]  ;;  %v41_v4 = vld [vmem:[%s359_s3 + $0x10] sm:$0xff]  ;;  %199 = vmatprep.mubr.msk.f32.mxu0 %vm259_vm1, %v260_v9 }
   0x2   :  { %v39_v1 = vld [vmem:[%s359_s3] sm:$0xff]  ;;  %26 = vrot.lane.b32.xlu0 %v24_v0, %s257_s22  ;;  %v42_v5 = vld [vmem:[%s359_s3 + $0x18] sm:$0xff]  ;;  %v44_v12 = vld [vmem:[%s359_s3 + $0x28] sm:$0xff] }
   0x3   :  { %v31_v6 = vld [vmem:[%s358_s2] sm:$0xff]  ;;  %v203_v7 = vpack.c.bf16 %v40_v3, %v39_v1  ;;  %v206_v10 = vpack.c.bf16 %v42_v5, %v41_v4 }
   0x4   :  { %v21_v8 = vld [vmem:[%s356_s0] sm:$0xff] }
   0x5   :  { %23 = vst.msk [vmem:[#allocation2] sm:$0xff] %vm22_vm0, %v21_v8  ;;  %204 = vmatpush3.bf16.msra.mxu0 %v203_v7  ;;  %v43_v11 = vld [vmem:[%s359_s3 + $0x20] sm:$0xff] }
   0x6   :  { %33 = vrot.lane.b32.xlu0 %v31_v6, %s261_s7  ;;  %205 = vmatprep.subr.bf16.mxu0 %v258_v2 }
   0x7   :  { %10 = vsyncpa [#allocation4], 0  ;;  %v209_v13 = vpack.c.bf16 %v44_v12, %v43_v11  ;;  %v45_v14 = vld [vmem:[%s359_s3 + $0x30] sm:$0xff]  ;;  %v46_v15 = vld [vmem:[%s359_s3 + $0x38] sm:$0xff]  ;;  %vm29_vm2 = vcmask 523520   ;;  %vm36_vm3 = vcmask 785920  }
   0x8   :  { %v212_v16 = vpack.c.bf16 %v46_v15, %v45_v14  ;;  %v47_v17 = vld [vmem:[%s359_s3 + $0x40] sm:$0xff]  ;;  %v48_v18 = vld [vmem:[%s359_s3 + $0x48] sm:$0xff]  ;;  %v49_v20 = vld [vmem:[%s359_s3 + $0x50] sm:$0xff]  ;;  %vm58_vm4 = vcmask 785408   ;;  %s263_s24 = smov [#allocation3]  }
   0x9   :  { %207 = vmatpush3.bf16.msra.mxu0 %v206_v10  ;;  %v215_v19 = vpack.c.bf16 %v48_v18, %v47_v17  ;;  %v50_v21 = vld [vmem:[%s359_s3 + $0x58] sm:$0xff]  ;;  %v159_v26 = vld [vmem:[%s360_s4] ss:$0 sm:$0xff]  ;;  %s262_s3 = smov 96   ;;  %s151_s25 = sshll.u32 %s263_s24, 4  ;;  %s152_s25 = int_to_ptr.vmem [resolvable:$true] %s151_s25 }
   0xa   :  { %208 = vmatprep.subr.bf16.mxu0 %v258_v2  ;;  %v218_v22 = vpack.c.bf16 %v50_v21, %v49_v20  ;;  %s233_s4 = scalar_lea.vmem %s152_s25, 128  ;;  %p238_p1 = scmp.lt.s32.totalorder %s152_s25, %s152_s25 }
   0xb   :  { %p234_p0 = scmp.ne.s32.totalorder %s152_s25, %s233_s4  ;;  %p239_p2 = scmp.lt.s32.totalorder %s233_s4, %s233_s4 }
   0xd   :  { %210 = vmatpush3.bf16.msra.mxu0 %v209_v13  ;;  %p240_p3 = por %p239_p2, %p238_p1 }
   0xe   :  { %211 = vmatprep.subr.bf16.mxu0 %v258_v2 }
   0xf   :  { %p241_p4 = pnand %p240_p3, %p234_p0 }
  0x11   :  { %213 = vmatpush3.bf16.msra.mxu0 %v212_v16 }
  0x12   :  { %214 = vmatprep.subr.bf16.mxu0 %v258_v2 }
  0x15   :  { %216 = vmatpush3.bf16.msra.mxu0 %v215_v19 }
  0x16   :  { %217 = vmatprep.subr.bf16.mxu0 %v258_v2 }
  0x19   :  { %219 = vmatpush3.bf16.msra.mxu0 %v218_v22 }
  0x74   :  { %v27_v23 = vpop.permute.xlu0 %26 }
  0x75   :  { %30 = vst.msk [vmem:[#allocation2] sm:$0xff] %vm29_vm2, %v27_v23 }
  0x78   :  { %v34_v24 = vpop.permute.xlu0 %33 }
  0x79   :  { %37 = vst.msk [vmem:[#allocation2] sm:$0xff] %vm36_vm3, %v34_v24 }
  0x80   :  { %v38_v25 = vld [vmem:[#allocation2] sm:$0xff] }
  0x81   :  { %200 = vmatmul.mubr.msk.f32.vlgmr.msra.gmra.mrb[0].mxu0 %vm58_vm4, %v38_v25 }
 0x154   :  { %v128_v27 = vpop.f32.mrb[0].mxu0 }
 0x155   :  { %v129_v28 = vadd.f32 %v159_v26, %v128_v27  ;;  %v201_v29 = vpop.f32.mrb[1].mxu0 }
 0x157   :  { %v161_v30 = vmul.f32 -1.442695, %v129_v28 }
 0x159   :  { %227 = vpow2.f32 %v161_v30 }
 0x163   :  { %v228_v31 = vpop.eup %227 }
 0x164   :  { %v136_v32 = vadd.f32 1.0, %v228_v31 }
 0x166   :  { %229 = vrcp.f32 %v136_v32 }
 0x167   :  { %231 = vtanh.f32 %v129_v28 }
 0x170   :  { %v230_v33 = vpop.eup %229 }
 0x171   :  { %140 = vrot.lane.b32.xlu1 %v230_v33, %s262_s3  ;;  %v232_v34 = vpop.eup %231 }
 0x1e3   :  { %v141_v35 = vpop.permute.xlu1 %140 }
 0x1e4   :  { %v143_v36 = vmul.f32 %v232_v34, %v141_v35 }
 0x1e6   :  { %144 = vst.msk [vmem:[#allocation3] sm:$0xff] %vm22_vm0, %v143_v36 }
 0x1e7   :  { %244 = shalt.err (!%p241_p4)
}
 0x1e8   :  { %s245_s28 = scalar_lea.hbm %s361_s5, 128 }
 0x1e9   :  { %p246_p5 = scmp.ne.s32.totalorder %s361_s5, %s245_s28  ;;  %p249_p6 = scmp.lt.u32.totalorder %s245_s28, %s361_s5 }
 0x1eb   :  { %p251_p7 = pnand %p249_p6, %p246_p5 }
 0x1ed   :  { %254 = shalt.err (!%p251_p7)
}
 0x1ee   :  { %154 = dma.vmem_to_hbm [thread:$0]  %s152_s25, 128, %s361_s5, [#allocation4]  }
 0x1ef   :  { %255 = dma.done.wait [#allocation4], 128  }
 0x1f0   :  { %256 = vsyncadd [#allocation4], 4294967168 }
 0x1f1   :  { %158 = vsyncpa [#allocation4], 1 }

</bundles_post_ra>
